<compile_context>
chip_gen: v7x
topology: tpu7x:2x2x1
jax: 0.10.0
libtpu: 0.0.40
codegen_flags: <defaults>
</compile_context>

<pallas_src>
import numpy as np
import jax
import jax.numpy as jnp
from jax.experimental import pallas as pl
from jax.experimental.pallas import tpu as pltpu

# ---- model hyper-parameters (AngleNet(Fr, Lh, terms=['harmonic'], trainable=True)) ----
FR = 8                      # per-node feature size
LH = [32, 32]               # hidden sizes of each ParameterPredictor
L_IN = 2 * FR               # node_input feature size (16)
THETA0_SHIFT = float((109.5 * np.pi / 180.0) ** 0.5)
K_SHIFT = float(10.0 ** 0.5)

TILE_A_MAX = 8192           # max angles (lanes) per grid step, multiple of 128


def _round_up(n, m):
    return ((n + m - 1) // m) * m


# ----------------------------- TPU generation knobs -------------------------
def _tpu_kind():
    try:
        return jax.devices()[0].device_kind.lower()
    except Exception:
        return ""


def _default_weight_dtype(kind):
    """bf16 matmul/tanh path on v6e/v7x (bf16 VPU/EUP/MXU); f32 elsewhere."""
    # TODO(synk): device_kind string matching is fragile; unknown kinds fall
    # back to f32 (correct, just slower).
    if any(tag in kind for tag in ("v6", "v7", "7x")):
        return jnp.bfloat16
    return jnp.float32


def _num_tensorcores(kind):
    # v7x has 2 TensorCores per chip; v5e/v6e have 1.
    return 2 if ("v7" in kind or "7x" in kind) else 1


def _vmem_limit_bytes(kind):
    if "v7" in kind or "7x" in kind:
        return 48 * 1024 * 1024     # 64 MiB physical per TC -> leave headroom
    return 64 * 1024 * 1024         # v5e / v6e: 128 MiB physical


def _choose_tile(A, num_cores):
    """Pick (tile, A_pad): lane tiles are multiples of 128, padding is bounded,
    and on multi-TC chips we force >= 2 grid steps so "parallel" shards work."""
    min_steps = 2 if (num_cores > 1 and A > 128) else 1
    best = None
    for tile in (8192, 4096, 2048, 1024, 512, 256, 128):
        if tile > TILE_A_MAX:
            continue
        A_pad = _round_up(max(A, 1), tile)
        steps = max(A_pad // tile, min_steps)
        A_pad = steps * tile
        # cost ~ dead padded rows + per-step pipeline overhead (~0.35us/step,
        # roughly a few hundred rows of this tiny MLP)
        cost = (A_pad - A) + 256 * steps
        if best is None or cost < best[1]:
            best = (tile, cost, A_pad)
    return best[0], best[2]


# --------------------------- Pallas kernel ---------------------------------
def anglenet_kernel(x_ref, th_ref, wslab_ref, bslab_ref, out_ref):
    """One lane-tile of angles (transposed layout, angles on lanes).

    x_ref     : (16, T)   node_input^T  (compute dtype)
    th_ref    : (1,  T)   theta^T       (f32)
    wslab_ref : (2*H2+8, H2) fused MLP weights, sublane-stacked [W0^T;W1^T;W2^T]
    bslab_ref : (2*H2+8, 1)  fused MLP biases,  sublane-stacked [b0^T;b1^T;b2^T]
    out_ref   : (3,  T)   rows = [theta0 | k | e]   (f32)
    """
    l_in = x_ref.shape[0]
    h2 = wslab_ref.shape[1]                 # fused hidden width (= 2 * LH)
    cdt = wslab_ref.dtype                   # compute dtype (f32 or bf16)

    x = x_ref[...].astype(cdt)              # (l_in, T)

    # Static slab slices: every chunk starts at lane 0 and at a sublane offset
    # that is a multiple of 8.
    w0t = wslab_ref[0:h2, 0:l_in]           # (h2, l_in)
    w1t = wslab_ref[h2:2 * h2, :]           # (h2, h2)
    w2t = wslab_ref[2 * h2:2 * h2 + 8, :]   # (8, h2)  rows 0/1 real, 2..7 zero
    b0t = bslab_ref[0:h2, :]                # (h2, 1) f32
    b1t = bslab_ref[h2:2 * h2, :]           # (h2, 1) f32
    b2t = bslab_ref[2 * h2:2 * h2 + 8, :]   # (8, 1)  f32 (sqrt-shifts folded in)

    # Fused MLP for both predictors at once (Linear-Tanh-Linear-Tanh-Linear).
    h = jnp.dot(w0t, x, preferred_element_type=jnp.float32) + b0t
    h = jnp.tanh(h.astype(cdt))
    h = jnp.dot(w1t, h, preferred_element_type=jnp.float32) + b1t
    h = jnp.tanh(h.astype(cdt))
    raw = jnp.dot(w2t, h, preferred_element_type=jnp.float32) + b2t   # (8, T) f32

    params = raw * raw                      # row 0 = theta0, row 1 = k
    theta0 = params[0:1, :]
    k = params[1:2, :]
    theta = th_ref[...]                     # (1, T) f32
    d = theta - theta0
    e = 0.5 * k * d * d                     # (1, T)

    out_ref[...] = jnp.concatenate([theta0, k, e], axis=0)   # (3, T), lane-dense


def anglenet_pallas(x_t, th_t, wslab, bslab, *, tile, vmem_limit):
    """x_t: (16, A_pad), th_t: (1, A_pad); A_pad % tile == 0, tile % 128 == 0."""
    feat, A_pad = x_t.shape
    assert A_pad % tile == 0 and tile % 128 == 0
    grid = (A_pad // tile,)

    def col_spec(rows):
        return pl.BlockSpec((rows, tile), lambda i: (0, i))

    def const_spec(arr):
        return pl.BlockSpec(arr.shape, lambda i: (0, 0))

    return pl.pallas_call(
        anglenet_kernel,
        out_shape=jax.ShapeDtypeStruct((3, A_pad), jnp.float32),
        grid_spec=pltpu.PrefetchScalarGridSpec(
            num_scalar_prefetch=0,
            grid=grid,
            in_specs=[col_spec(feat),        # node_input^T (streamed)
                      col_spec(1),           # theta^T      (streamed)
                      const_spec(wslab),     # fused weights (VMEM-resident)
                      const_spec(bslab)],    # fused biases  (VMEM-resident)
            out_specs=col_spec(3),
        ),
        compiler_params=pltpu.CompilerParams(
            dimension_semantics=("parallel",),   # no cross-tile accumulator
            vmem_limit_bytes=vmem_limit,
        ),
    )(x_t, th_t, wslab, bslab)


# --------------------------- weight packing ---------------------------------
def pack_fused_mlp(theta0_params, k_params, weight_dtype):
    """Fuse the two (16->32->32->1) MLPs into one (16->64->64->2) chain and pack
    the result into a sublane-stacked weight slab + bias slab."""
    t_w0, t_b0, t_w1, t_b1, t_w2, t_b2 = theta0_params
    k_w0, k_b0, k_w1, k_b1, k_w2, k_b2 = k_params
    H = t_w1.shape[0]
    H2 = 2 * H
    zHH = jnp.zeros((H, H), jnp.float32)
    zH1 = jnp.zeros((H, 1), jnp.float32)

    w0 = jnp.concatenate([t_w0, k_w0], axis=1)                        # (16, H2)
    b0 = jnp.concatenate([t_b0, k_b0], axis=1)                        # (1,  H2)
    w1 = jnp.block([[t_w1, zHH], [zHH, k_w1]])                        # (H2, H2)
    b1 = jnp.concatenate([t_b1, k_b1], axis=1)                        # (1,  H2)
    w2 = jnp.block([[t_w2, zH1], [zH1, k_w2]])                        # (H2, 2)
    # fold the sqrt-shifts into the last bias:  (shift + (x@W2 + b2))^2
    b2 = jnp.concatenate([t_b2 + THETA0_SHIFT, k_b2 + K_SHIFT], axis=1)  # (1, 2)

    l_in = w0.shape[0]
    w0t = jnp.pad(w0.T, ((0, 0), (0, H2 - l_in)))                     # (H2, H2)
    w1t = w1.T                                                        # (H2, H2)
    w2t = jnp.pad(w2.T, ((0, 8 - 2), (0, 0)))                         # (8,  H2)
    wslab = jnp.concatenate([w0t, w1t, w2t], axis=0)                  # (2*H2+8, H2)

    b2t = jnp.pad(b2.T, ((0, 8 - 2), (0, 0)))                         # (8, 1)
    bslab = jnp.concatenate([b0.T, b1.T, b2t], axis=0)                # (2*H2+8, 1)

    # Weights in compute dtype (bf16 on v6e/v7x); biases stay f32.
    return wslab.astype(weight_dtype), bslab.astype(jnp.float32)


# --------------------------- glue (plain JAX) -------------------------------
def make_mlp_params(key, l_in, l_hidden, l_out):
    """Deterministic PyTorch-Linear-style init, weights stored (in, out)."""
    params = []
    dims = [l_in] + list(l_hidden) + [l_out]
    for i in range(len(dims) - 1):
        fan_in, fan_out = dims[i], dims[i + 1]
        key, kw, kb = jax.random.split(key, 3)
        bound = 1.0 / np.sqrt(fan_in)
        w = jax.random.uniform(kw, (fan_in, fan_out), jnp.float32, -bound, bound)
        b = jax.random.uniform(kb, (1, fan_out), jnp.float32, -bound, bound)
        params += [w, b]
    return params


def angle_geometry(r, xyz, angles):
    """Data-dependent gather + theta; matches the torch D/expand construction."""
    # TODO(synk): the angle-index gather of xyz/r and arccos stay in JAX glue
    # (data-dependent gather has no static BlockSpec expression).
    a0, a1, a2 = angles[:, 0], angles[:, 1], angles[:, 2]
    v1 = xyz[a1] - xyz[a0]            # D[a0, a1] = xyz[a1] - xyz[a0]
    v2 = xyz[a2] - xyz[a1]            # D[a1, a2] = xyz[a2] - xyz[a1]
    dot_unnorm = jnp.sum(-v1 * v2, axis=1)
    norm = jnp.sqrt(jnp.sum(v1 * v1, axis=1) * jnp.sum(v2 * v2, axis=1))
    cos_theta = (dot_unnorm / norm)[:, None]
    theta = jnp.arccos(cos_theta / 1.000001)                       # (A, 1)
    node_input = jnp.concatenate([r[a0] + r[a2], r[a1]], axis=1)   # (A, 2*Fr)
    return theta, node_input


def anglenet_forward(r, batch, xyz, theta0_params, k_params, weight_dtype=None):
    angles = batch["angles"]
    num_angles = [int(n) for n in batch["num_angles"]]
    M = len(num_angles)
    if num_angles == [0] * M:
        return jnp.zeros((M,), jnp.float32), None, None

    kind = _tpu_kind()
    if weight_dtype is None:
        weight_dtype = _default_weight_dtype(kind)

    theta, node_input = angle_geometry(r, xyz, angles)   # (A,1) f32, (A,16) f32
    A = theta.shape[0]

    tile, A_pad = _choose_tile(A, _num_tensorcores(kind))
    pad = A_pad - A

    # Transposed, lane-dense streams: angles on lanes, features on sublanes.
    x_t = jnp.pad(node_input.astype(weight_dtype).T, ((0, 0), (0, pad)))  # (16, A_pad)
    th_t = jnp.pad(theta.T, ((0, 0), (0, pad)))                           # (1,  A_pad)

    wslab, bslab = pack_fused_mlp(theta0_params, k_params, weight_dtype)

    out = anglenet_pallas(x_t, th_t, wslab, bslab,
                          tile=tile, vmem_limit=_vmem_limit_bytes(kind))  # (3, A_pad)

    # NOTE: padded columns A..A_pad hold garbage params/energies; always slice
    # to :A before any reduction.
    theta0 = out[0, :A][:, None]
    k = out[1, :A][:, None]
    e = out[2, :A]

    # Per-molecule reduction (angles are contiguous & ordered by molecule,
    # exactly as torch.split(E, num_angles) assumes).
    # TODO(synk): seg_ids uses host-side Python ints; rework if num_angles is traced.
    seg_ids = jnp.asarray(np.repeat(np.arange(M), num_angles).astype(np.int32))
    E = jax.ops.segment_sum(e, seg_ids, num_segments=M)[:, None]   # (M, 1)

    learned = {"harmonic": {"theta0": theta0, "k": k}}
    return E, theta, learned


# --------------------------- pure-JAX reference -----------------------------
def reference_forward(r, batch, xyz, theta0_params, k_params):
    theta, x = angle_geometry(r, xyz, batch["angles"])

    def mlp(p):
        w0, b0, w1, b1, w2, b2 = p
        h = jnp.tanh(x @ w0 + b0)
        h = jnp.tanh(h @ w1 + b1)
        return h @ w2 + b2

    theta0 = jnp.square(THETA0_SHIFT + mlp(theta0_params))
    k = jnp.square(K_SHIFT + mlp(k_params))
    E = k / 2.0 * jnp.square(theta - theta0)            # (A, 1)
    sums, off = [], 0
    for n in [int(v) for v in batch["num_angles"]]:
        sums.append(E[off:off + n].sum(axis=0))
        off += n
    return jnp.stack(sums)                               # (M, 1)


# --------------------------------- main --------------------------------------
if __name__ == "__main__":
    key = jax.random.PRNGKey(0)
    k_r, k_xyz, k_c, k_d0, k_d2, k_t, k_k = jax.random.split(key, 7)

    N = 16                         # atoms
    num_angles = [10, 14]          # angles per molecule
    A = sum(num_angles)

    r = jax.random.normal(k_r, (N, FR), jnp.float32)
    xyz = jax.random.normal(k_xyz, (N, 3), jnp.float32)

    # build valid angle triples (a0, a1, a2) with distinct atoms
    a1 = jax.random.randint(k_c, (A,), 0, N)
    d0 = jax.random.randint(k_d0, (A,), 1, N // 2)
    d2 = jax.random.randint(k_d2, (A,), N // 2, N - 1)
    a0 = (a1 + d0) % N
    a2 = (a1 + d2) % N
    angles = jnp.stack([a0, a1, a2], axis=1).astype(jnp.int32)

    batch = {"angles": angles, "num_angles": num_angles}

    theta0_params = make_mlp_params(k_t, L_IN, LH, 1)
    k_params = make_mlp_params(k_k, L_IN, LH, 1)

    # 1) f32 Pallas path: tight check against the pure-JAX reference.
    E32, theta, learned = anglenet_forward(r, batch, xyz, theta0_params, k_params,
                                           weight_dtype=jnp.float32)
    E32 = jax.block_until_ready(E32)
    E_ref = reference_forward(r, batch, xyz, theta0_params, k_params)
    np.testing.assert_allclose(np.asarray(E32), np.asarray(E_ref),
                               rtol=1e-4, atol=1e-4)

    # 2) Generation-default path; if it is bf16 (v6e/v7x), validate it against
    #    the f32 Pallas run (the f32 run above is the strict correctness anchor;
    #    this loose check only bounds bf16 rounding of the same kernel).
    wdtype = _default_weight_dtype(_tpu_kind())
    if wdtype != jnp.float32:
        Ebf, _, _ = anglenet_forward(r, batch, xyz, theta0_params, k_params,
                                     weight_dtype=wdtype)
        Ebf = jax.block_until_ready(Ebf)
        np.testing.assert_allclose(np.asarray(Ebf), np.asarray(E32),
                                   rtol=1e-1, atol=1.0)

    assert E32.shape == (len(num_angles), 1)
    assert learned["harmonic"]["theta0"].shape == (A, 1)
    assert learned["harmonic"]["k"].shape == (A, 1)

    print("KERNEL_OK")
</pallas_src>

<mosaic_0001>
module attributes {stable_mosaic.version = 11 : i64} {
  func.func @anglenet_kernel(%arg0: i32, %arg1: memref<16x128xf32, #tpu.memory_space<vmem>>, %arg2: memref<1x128xf32, #tpu.memory_space<vmem>>, %arg3: memref<136x64xf32, #tpu.memory_space<vmem>>, %arg4: memref<136x1xf32, #tpu.memory_space<vmem>>, %arg5: memref<3x128xf32, #tpu.memory_space<vmem>>) attributes {dimension_semantics = [#tpu.dimension_semantics<parallel>], iteration_bounds = array<i64: 1>, scalar_prefetch = 0 : i64, scratch_operands = 0 : i64, tpu.core_type = #tpu.core_type<tc>, window_params = [{transform_indices = @transform_0, window_bounds = array<i64: 16, 128>}, {transform_indices = @transform_1, window_bounds = array<i64: 1, 128>}, {pipeline_mode = #tpu.pipeline_mode<synchronous>, transform_indices = @transform_2, window_bounds = array<i64: 136, 64>}, {pipeline_mode = #tpu.pipeline_mode<synchronous>, transform_indices = @transform_3, window_bounds = array<i64: 136, 1>}, {transform_indices = @transform_4, window_bounds = array<i64: 3, 128>}]} {
    %c0 = arith.constant 0 : index
    %c0_0 = arith.constant 0 : index
    %0 = vector.load %arg1[%c0, %c0_0] : memref<16x128xf32, #tpu.memory_space<vmem>>, vector<16x128xf32>
    %c0_1 = arith.constant 0 : index
    %c0_2 = arith.constant 0 : index
    %1 = vector.load %arg3[%c0_1, %c0_2] : memref<136x64xf32, #tpu.memory_space<vmem>>, vector<64x16xf32>
    %c64 = arith.constant 64 : index
    %c0_3 = arith.constant 0 : index
    %2 = vector.load %arg3[%c64, %c0_3] : memref<136x64xf32, #tpu.memory_space<vmem>>, vector<64x64xf32>
    %c128 = arith.constant 128 : index
    %c0_4 = arith.constant 0 : index
    %3 = vector.load %arg3[%c128, %c0_4] : memref<136x64xf32, #tpu.memory_space<vmem>>, vector<8x64xf32>
    %c0_5 = arith.constant 0 : index
    %c0_6 = arith.constant 0 : index
    %4 = vector.load %arg4[%c0_5, %c0_6] : memref<136x1xf32, #tpu.memory_space<vmem>>, vector<64x1xf32>
    %c64_7 = arith.constant 64 : index
    %c0_8 = arith.constant 0 : index
    %5 = vector.load %arg4[%c64_7, %c0_8] : memref<136x1xf32, #tpu.memory_space<vmem>>, vector<64x1xf32>
    %c128_9 = arith.constant 128 : index
    %c0_10 = arith.constant 0 : index
    %6 = vector.load %arg4[%c128_9, %c0_10] : memref<136x1xf32, #tpu.memory_space<vmem>>, vector<8x1xf32>
    %cst = arith.constant dense<0.000000e+00> : vector<64x128xf32>
    %7 = tpu.matmul %1, %0, %cst {dimension_numbers = #tpu.dot_dimension_numbers<[1], [0], [0], [1], [0, 0, 1, 1], [], []>} : vector<64x16xf32>, vector<16x128xf32>, vector<64x128xf32> -> vector<64x128xf32>
    %8 = vector.broadcast %4 : vector<64x1xf32> to vector<64x128xf32>
    %9 = arith.addf %7, %8 : vector<64x128xf32>
    %10 = math.tanh %9 : vector<64x128xf32>
    %cst_11 = arith.constant dense<0.000000e+00> : vector<64x128xf32>
    %11 = tpu.matmul %2, %10, %cst_11 {dimension_numbers = #tpu.dot_dimension_numbers<[1], [0], [0], [1], [0, 0, 1, 1], [], []>} : vector<64x64xf32>, vector<64x128xf32>, vector<64x128xf32> -> vector<64x128xf32>
    %12 = vector.broadcast %5 : vector<64x1xf32> to vector<64x128xf32>
    %13 = arith.addf %11, %12 : vector<64x128xf32>
    %14 = math.tanh %13 : vector<64x128xf32>
    %cst_12 = arith.constant dense<0.000000e+00> : vector<8x128xf32>
    %15 = tpu.matmul %3, %14, %cst_12 {dimension_numbers = #tpu.dot_dimension_numbers<[1], [0], [0], [1], [0, 0, 1, 1], [], []>} : vector<8x64xf32>, vector<64x128xf32>, vector<8x128xf32> -> vector<8x128xf32>
    %16 = vector.broadcast %6 : vector<8x1xf32> to vector<8x128xf32>
    %17 = arith.addf %15, %16 : vector<8x128xf32>
    %18 = arith.mulf %17, %17 : vector<8x128xf32>
    %19 = vector.extract_strided_slice %18 {offsets = [0, 0], sizes = [1, 128], strides = [1, 1]} : vector<8x128xf32> to vector<1x128xf32>
    %20 = vector.extract_strided_slice %18 {offsets = [1, 0], sizes = [1, 128], strides = [1, 1]} : vector<8x128xf32> to vector<1x128xf32>
    %c0_13 = arith.constant 0 : index
    %c0_14 = arith.constant 0 : index
    %21 = vector.load %arg2[%c0_13, %c0_14] : memref<1x128xf32, #tpu.memory_space<vmem>>, vector<1x128xf32>
    %22 = arith.subf %21, %19 : vector<1x128xf32>
    %cst_15 = arith.constant 5.000000e-01 : f32
    %23 = vector.broadcast %cst_15 : f32 to vector<1x128xf32>
    %24 = arith.mulf %23, %20 : vector<1x128xf32>
    %25 = arith.mulf %24, %22 : vector<1x128xf32>
    %26 = arith.mulf %25, %22 : vector<1x128xf32>
    %27 = tpu.concatenate %19, %20, %26 in 0 : vector<1x128xf32>, vector<1x128xf32>, vector<1x128xf32> -> vector<3x128xf32>
    %c0_16 = arith.constant 0 : index
    %c0_17 = arith.constant 0 : index
    %28 = vector.load %arg5[%c0_16, %c0_17] : memref<3x128xf32, #tpu.memory_space<vmem>>, vector<3x128xf32>
    tpu.vector_store %arg5[%c0_16, %c0_17], %27 {strides = array<i32>} : memref<3x128xf32, #tpu.memory_space<vmem>>, vector<3x128xf32>,
    return
  }
  func.func @transform_0(%arg0: i32) -> (i32, i32) {
    %c0_i32 = arith.constant 0 : i32
    %c0_i32_0 = arith.constant 0 : i32
    return %c0_i32, %arg0 : i32, i32
  }
  func.func @transform_1(%arg0: i32) -> (i32, i32) {
    %c0_i32 = arith.constant 0 : i32
    %c0_i32_0 = arith.constant 0 : i32
    return %c0_i32, %arg0 : i32, i32
  }
  func.func @transform_2(%arg0: i32) -> (i32, i32) {
    %c0_i32 = arith.constant 0 : i32
    %c0_i32_0 = arith.constant 0 : i32
    %c0_i32_1 = arith.constant 0 : i32
    return %c0_i32, %c0_i32_0 : i32, i32
  }
  func.func @transform_3(%arg0: i32) -> (i32, i32) {
    %c0_i32 = arith.constant 0 : i32
    %c0_i32_0 = arith.constant 0 : i32
    %c0_i32_1 = arith.constant 0 : i32
    return %c0_i32, %c0_i32_0 : i32, i32
  }
  func.func @transform_4(%arg0: i32) -> (i32, i32) {
    %c0_i32 = arith.constant 0 : i32
    %c0_i32_0 = arith.constant 0 : i32
    return %c0_i32, %arg0 : i32, i32
  }
}

</mosaic_0001>

<bundles_post_ra>
// kernel: tpu_custom_call.1
= control target key start
LH: loop header
LB: loop body
LE: loop exit
PB: predicated region body
PF: predicated region fallthrough
CT: control target
= control target key end

     0   :  { %9 = vsyncpa [#allocation3], 0  ;;  %s1022_s0 = inlined_call_operand.hbm [shape: f32[16,128], index: 0, kind: input, shape index: {}]   ;;  %s1023_s1 = inlined_call_operand.hbm [shape: f32[1,128], index: 1, kind: input, shape index: {}]   ;;  %s1024_s2 = inlined_call_operand.hbm [shape: f32[136,64], index: 2, kind: input, shape index: {}]   ;;  %s1025_s3 = inlined_call_operand.hbm [shape: f32[136,1], index: 3, kind: input, shape index: {}]   ;;  %s1026_s4 = inlined_call_operand.hbm [shape: f32[3,128], index: 4, kind: output, shape index: {}]  }
   0x1   :  { %10 = vsyncpa [#allocation6], 0 }
   0x2   :  { %11 = vsyncpa [#allocation9], 0 }
   0x3   :  { %12 = vsyncpa [#allocation4], 0  ;;  %s886_s15 = smov [#allocation5]   ;;  %s887_s17 = smov [#allocation2]  }
   0x4   :  { %s31_s16 = sshll.u32 %s886_s15, 4  ;;  %s18_s18 = sshll.u32 %s887_s17, 4  ;;  %s32_s16 = int_to_ptr.vmem [resolvable:$true] %s31_s16  ;;  %s922_s18 = int_to_ptr.vmem [resolvable:$true] %s18_s18 }
   0x5   :  { %s768_s21 = scalar_lea.hbm %s1023_s1, 16 }
   0x6   :  { %p769_p0 = scmp.ne.s32.totalorder %s1023_s1, %s768_s21  ;;  %p772_p1 = scmp.lt.u32.totalorder %s768_s21, %s1023_s1 }
   0x8   :  { %p774_p2 = pnand %p772_p1, %p769_p0 }
   0xa   :  { %777 = shalt.err (!%p774_p2)
}
   0xb   :  { %s778_s26 = scalar_lea.vmem %s32_s16, 16  ;;  %s782_s27 = scalar_lea.vmem %s32_s16, 32 }
   0xc   :  { %p779_p3 = scmp.ne.s32.totalorder %s32_s16, %s778_s26  ;;  %p783_p4 = scmp.lt.s32.totalorder %s32_s16, %s32_s16 }
   0xd   :  { %p784_p5 = scmp.lt.s32.totalorder %s782_s27, %s778_s26 }
   0xf   :  { %p785_p6 = por %p784_p5, %p783_p4 }
  0x11   :  { %p786_p7 = pnand %p785_p6, %p779_p3 }
  0x13   :  { %789 = shalt.err (!%p786_p7)
}
  0x14   :  { %34 = dma.hbm_to_vmem [thread:$0]  %s1023_s1, 16, %s32_s16, [#allocation6]  }
  0x15   :  { %s790_s6 = scalar_lea.hbm %s1022_s0, 256 }
  0x16   :  { %p791_p8 = scmp.ne.s32.totalorder %s1022_s0, %s790_s6  ;;  %p794_p9 = scmp.lt.u32.totalorder %s790_s6, %s1022_s0 }
  0x18   :  { %p796_p10 = pnand %p794_p9, %p791_p8 }
  0x1a   :  { %799 = shalt.err (!%p796_p10)
}
  0x1b   :  { %s800_s11 = scalar_lea.vmem %s922_s18, 256  ;;  %p805_p12 = scmp.lt.s32.totalorder %s922_s18, %s922_s18 }
  0x1c   :  { %p801_p11 = scmp.ne.s32.totalorder %s922_s18, %s800_s11  ;;  %p806_p13 = scmp.lt.s32.totalorder %s800_s11, %s800_s11 }
  0x1e   :  { %p807_p0 = por %p806_p13, %p805_p12 }
  0x20   :  { %p808_p1 = pnand %p807_p0, %p801_p11 }
  0x22   :  { %811 = shalt.err (!%p808_p1)
}
  0x23   :  { %s888_s1 = smov 128   ;;  %s889_s12 = smov 8  }
  0x24   :  { %24 = dma.hbm_to_vmem [thread:$0]  %s1022_s0, 256, %s922_s18, [#allocation3], %s888_s1, %s888_s1, %s889_s12  }
  0x25   :  { %s890_s15 = smov [#allocation7]   ;;  %s891_s17 = smov [#allocation8]  }
  0x26   :  { %s40_s16 = sshll.u32 %s890_s15, 4  ;;  %s52_s19 = sshll.u32 %s891_s17, 4  ;;  %s41_s16 = int_to_ptr.vmem [resolvable:$true] %s40_s16  ;;  %s956_s19 = int_to_ptr.vmem [resolvable:$true] %s52_s19 }
  0x27   :  { %s812_s22 = scalar_lea.hbm %s1024_s2, 2176 }
  0x28   :  { %p813_p2 = scmp.ne.s32.totalorder %s1024_s2, %s812_s22  ;;  %p816_p3 = scmp.lt.u32.totalorder %s812_s22, %s1024_s2 }
  0x2a   :  { %p818_p4 = pnand %p816_p3, %p813_p2 }
  0x2c   :  { %821 = shalt.err (!%p818_p4)
}
  0x2d   :  { %s822_s0 = scalar_lea.vmem %s41_s16, 2176  ;;  %p827_p6 = scmp.lt.s32.totalorder %s41_s16, %s41_s16 }
  0x2e   :  { %p823_p5 = scmp.ne.s32.totalorder %s41_s16, %s822_s0  ;;  %p828_p7 = scmp.lt.s32.totalorder %s822_s0, %s822_s0 }
  0x30   :  { %p829_p8 = por %p828_p7, %p827_p6 }
  0x32   :  { %p830_p9 = pnand %p829_p8, %p823_p5 }
  0x34   :  { %833 = shalt.err (!%p830_p9)
}
  0x35   :  { %46 = dma.hbm_to_vmem [thread:$0]  %s1024_s2, 2176, %s41_s16, [#allocation6], %s888_s1, %s888_s1, %s889_s12  }
  0x36   :  { %s834_s30 = scalar_lea.hbm %s1025_s3, 2176 }
  0x37   :  { %p835_p10 = scmp.ne.s32.totalorder %s1025_s3, %s834_s30  ;;  %p838_p11 = scmp.lt.u32.totalorder %s834_s30, %s1025_s3 }
  0x39   :  { %p840_p12 = pnand %p838_p11, %p835_p10 }
  0x3b   :  { %843 = shalt.err (!%p840_p12)
}
  0x3c   :  { %s844_s9 = scalar_lea.vmem %s956_s19, 2176  ;;  %p849_p0 = scmp.lt.s32.totalorder %s956_s19, %s956_s19 }
  0x3d   :  { %p845_p13 = scmp.ne.s32.totalorder %s956_s19, %s844_s9  ;;  %p850_p1 = scmp.lt.s32.totalorder %s844_s9, %s844_s9 }
  0x3f   :  { %p851_p2 = por %p850_p1, %p849_p0 }
  0x41   :  { %p852_p3 = pnand %p851_p2, %p845_p13 }
  0x43   :  { %855 = shalt.err (!%p852_p3)
}
  0x44   :  { %58 = dma.hbm_to_vmem [thread:$0]  %s1025_s3, 2176, %s956_s19, [#allocation9], %s888_s1, %s888_s1, %s889_s12  }
  0x45   :  { %878 = dma.done.wait [#allocation3], 256  }
  0x46   :  { %879 = vsyncadd [#allocation3], 4294967040 }
  0x47   :  { %880 = dma.done.wait [#allocation6], 2192  }
  0x48   :  { %881 = vsyncadd [#allocation6], 4294965104 }
  0x49   :  { %882 = dma.done.wait [#allocation9], 2176  }
  0x4a   :  { %883 = vsyncadd [#allocation9], 4294965120  ;;  %v892_v0 = vmov 0   ;;  %vm147_vm0 = vcmask 130048   ;;  %v71_v1 = vld [vmem:[#allocation2] sm:$0xff]  ;;  %v72_v2 = vld [vmem:[#allocation2 + $0x8] sm:$0xff] }
  0x4b   :  { %734 = vset.pattern.permute.xlu0 %v892_v0  ;;  %735 = vset.pattern.permute.xlu1 %v892_v0  ;;  %v73_v3 = vld [vmem:[#allocation7] sm:$0xff]  ;;  %v691_v4 = vpack.c.bf16 %v72_v2, %v71_v1  ;;  %v90_v5 = vld [vmem:[#allocation8] sm:$0xff]  ;;  %v92_v7 = vld [vmem:[#allocation8 + $0x10] sm:$0xff]  ;;  %vm325_vm1 = vcmask 523264   ;;  %vm894_vm2 = vmmov 0   ;;  %s896_s3 = smov [#allocation10]  }
  0x4c   :  { %632 = vmatprep.mubr.msk.f32.mxu0 %vm147_vm0, %v73_v3  ;;  %v74_v6 = vld [vmem:[#allocation7 + $0x8] sm:$0xff]  ;;  %109 = vperm.xlu0 %734, %v90_v5   ;;  %v75_v8 = vld [vmem:[#allocation7 + $0x10] sm:$0xff]  ;;  %v93_v10 = vld [vmem:[#allocation8 + $0x18] sm:$0xff]  ;;  %s565_s11 = sshll.u32 %s896_s3, 4  ;;  %vm556_vm3 = vcmask 1041408   ;;  %s566_s11 = int_to_ptr.vmem [resolvable:$true] %s565_s11 }
  0x4d   :  { %692 = vmatprep.subr.bf16.mxu0 %v691_v4  ;;  %v91_v9 = vld [vmem:[#allocation8 + $0x8] sm:$0xff]  ;;  %119 = vperm.xlu1 %735, %v92_v7   ;;  %v76_v11 = vld [vmem:[#allocation7 + $0x18] sm:$0xff]  ;;  %v77_v12 = vld [vmem:[#allocation7 + $0x20] sm:$0xff]  ;;  %s856_s1 = scalar_lea.vmem %s566_s11, 64  ;;  %p861_p5 = scmp.lt.s32.totalorder %s566_s11, %s566_s11 }
  0x4e   :  { %694 = vmatpush3.bf16.msra.mxu0 %v691_v4  ;;  %v94_v13 = vld [vmem:[#allocation8 + $0x20] sm:$0xff]  ;;  %v95_v14 = vld [vmem:[#allocation8 + $0x28] sm:$0xff]  ;;  %v96_v17 = vld [vmem:[#allocation8 + $0x30] sm:$0xff]  ;;  %p857_p4 = scmp.ne.s32.totalorder %s566_s11, %s856_s1  ;;  %p862_p6 = scmp.lt.s32.totalorder %s856_s1, %s856_s1 }
  0x4f   :  { %v78_v15 = vld [vmem:[#allocation7 + $0x28] sm:$0xff]  ;;  %v79_v16 = vld [vmem:[#allocation7 + $0x30] sm:$0xff]  ;;  %v97_v18 = vld [vmem:[#allocation8 + $0x38] sm:$0xff] }
  0x50   :  { %114 = vperm.xlu0 %734, %v91_v9   ;;  %v80_v19 = vld [vmem:[#allocation7 + $0x38] sm:$0xff]  ;;  %v98_v20 = vld [vmem:[#allocation8 + $0x40] sm:$0xff]  ;;  %v99_v21 = vld [vmem:[#allocation8 + $0x48] sm:$0xff]  ;;  %v893_v9 = vmov 0.0|0.0   ;;  %p863_p7 = por %p862_p6, %p861_p5 }
  0x51   :  { %633 = vmatmul.mubr.msk.f32.vlgmr.msra.gmra.mrb[0].mxu0 %vm147_vm0, %v74_v6  ;;  %124 = vperm.xlu1 %735, %v93_v10   ;;  %v100_v22 = vld [vmem:[#allocation8 + $0x50] sm:$0xff]  ;;  %v101_v23 = vld [vmem:[#allocation8 + $0x58] sm:$0xff]  ;;  %v102_v24 = vld [vmem:[#allocation8 + $0x60] sm:$0xff]  ;;  %v895_v10 = vmov 0.0  }
  0x52   :  { %635 = vmatprep.mubr.msk.f32.mxu0 %vm147_vm0, %v75_v8  ;;  %v103_v25 = vld [vmem:[#allocation8 + $0x68] sm:$0xff]  ;;  %v104_v26 = vld [vmem:[#allocation8 + $0x70] sm:$0xff]  ;;  %v105_v27 = vld [vmem:[#allocation8 + $0x78] sm:$0xff]  ;;  %711 = vmatprep.subr.bf16.mxu0 %v893_v9  ;;  %p864_p8 = pnand %p863_p7, %p857_p4 }
  0x53   :  { %v106_v28 = vld [vmem:[#allocation8 + $0x80] sm:$0xff]  ;;  %v81_v29 = vld [vmem:[#allocation7 + $0x40] sm:$0xff]  ;;  %v83_v3 = vld [vmem:[#allocation7 + $0x50] sm:$0xff] }
  0x54   :  { %129 = vperm.xlu0 %734, %v94_v13   ;;  %660 = vmatprep.mubr.msk.f32.mxu1 %vm325_vm1, %v81_v29  ;;  %v82_v2 = vld [vmem:[#allocation7 + $0x48] sm:$0xff]  ;;  %v84_v4 = vld [vmem:[#allocation7 + $0x58] sm:$0xff]  ;;  %v85_v5 = vld [vmem:[#allocation7 + $0x60] sm:$0xff] }
  0x55   :  { %636 = vmatmul.mubr.msk.f32.gmra.mrb[2].mxu0 %vm147_vm0, %v76_v11  ;;  %134 = vperm.xlu1 %735, %v95_v14   ;;  %v86_v6 = vld [vmem:[#allocation7 + $0x68] sm:$0xff]  ;;  %v87_v7 = vld [vmem:[#allocation7 + $0x70] sm:$0xff]  ;;  %v88_v8 = vld [vmem:[#allocation7 + $0x78] sm:$0xff] }
  0x56   :  { %638 = vmatprep.mubr.msk.f32.mxu0 %vm147_vm0, %v77_v12 }
  0x58   :  { %139 = vperm.xlu0 %734, %v96_v17  }
  0x59   :  { %639 = vmatmul.mubr.msk.f32.gmra.mrb[4].mxu0 %vm147_vm0, %v78_v15  ;;  %144 = vperm.xlu1 %735, %v97_v18  }
  0x5a   :  { %641 = vmatprep.mubr.msk.f32.mxu0 %vm147_vm0, %v79_v16 }
  0x5c   :  { %287 = vperm.xlu0 %734, %v98_v20  }
  0x5d   :  { %642 = vmatmul.mubr.msk.f32.gmra.mrb[6].mxu0 %vm147_vm0, %v80_v19  ;;  %292 = vperm.xlu1 %735, %v99_v21  }
  0x5e   :  { %688 = vmatprep.mubr.msk.f32.mxu0 %vm894_vm2, %v895_v10 }
  0x60   :  { %297 = vperm.xlu0 %734, %v100_v22  }
  0x61   :  { %302 = vperm.xlu1 %735, %v101_v23  }
  0x64   :  { %307 = vperm.xlu0 %734, %v102_v24  }
  0x65   :  { %312 = vperm.xlu1 %735, %v103_v25  }
  0x68   :  { %317 = vperm.xlu0 %734, %v104_v26  }
  0x69   :  { %322 = vperm.xlu1 %735, %v105_v27  }
  0x6c   :  { %465 = vperm.xlu0 %734, %v106_v28  }
  0xcb   :  { %v110_v30 = vpop.permute.xlu0 %109 }
  0xcc   :  { %v120_v31 = vpop.permute.xlu1 %119 }
  0xcf   :  { %v115_v32 = vpop.permute.xlu0 %114 }
  0xd0   :  { %v125_v33 = vpop.permute.xlu1 %124 }
  0xd3   :  { %v130_v43 = vpop.permute.xlu0 %129 }
  0xd4   :  { %v135_v41 = vpop.permute.xlu1 %134 }
  0xd7   :  { %v140_v51 = vpop.permute.xlu0 %139 }
  0xd8   :  { %v145_v48 = vpop.permute.xlu1 %144 }
  0xdb   :  { %v288_v12 = vpop.permute.xlu0 %287 }
  0xdc   :  { %v293_v11 = vpop.permute.xlu1 %292 }
  0xdf   :  { %v298_v15 = vpop.permute.xlu0 %297 }
  0xe0   :  { %v303_v13 = vpop.permute.xlu1 %302 }
  0xe3   :  { %v308_v24 = vpop.permute.xlu0 %307 }
  0xe4   :  { %v313_v22 = vpop.permute.xlu1 %312 }
  0xe8   :  { %v323_v29 = vpop.permute.xlu1 %322 }
 0x124   :  { %v634_v34 = vpop.f32.mrb[0].mxu0 }
 0x125   :  { %v244_v35 = vadd.f32 %v634_v34, %v115_v32  ;;  %v238_v36 = vpop.f32.mrb[1].mxu0  ;;  %v318_v32 = vpop.permute.xlu0 %317 }
 0x126   :  { %v239_v37 = vadd.f32 %v238_v36, %v110_v30 }
 0x127   :  { %736 = vtanh.f32 %v244_v35 }
 0x128   :  { %738 = vtanh.f32 %v239_v37  ;;  %v637_v38 = vpop.f32.mrb[2].mxu0 }
 0x129   :  { %v254_v39 = vadd.f32 %v637_v38, %v125_v33  ;;  %v248_v40 = vpop.f32.mrb[3].mxu0 }
 0x12a   :  { %v249_v42 = vadd.f32 %v248_v40, %v120_v31 }
 0x12b   :  { %740 = vtanh.f32 %v254_v39 }
 0x12c   :  { %742 = vtanh.f32 %v249_v42  ;;  %v640_v44 = vpop.f32.mrb[4].mxu0 }
 0x12d   :  { %v264_v45 = vadd.f32 %v640_v44, %v135_v41  ;;  %v258_v46 = vpop.f32.mrb[5].mxu0 }
 0x12e   :  { %v259_v47 = vadd.f32 %v258_v46, %v130_v43 }
 0x12f   :  { %744 = vtanh.f32 %v264_v45 }
 0x130   :  { %746 = vtanh.f32 %v259_v47  ;;  %v643_v49 = vpop.f32.mrb[6].mxu0  ;;  %v89_v47 = vld [vmem:[#allocation7 + $0x80] sm:$0xff] }
 0x131   :  { %v737_v50 = vpop.eup %736  ;;  %v274_v52 = vadd.f32 %v643_v49, %v145_v48  ;;  %v268_v53 = vpop.f32.mrb[7].mxu0  ;;  %v546_v48 = vlaneseq }
 0x132   :  { %v739_v54 = vpop.eup %738  ;;  %v269_v55 = vadd.f32 %v268_v53, %v140_v51 }
 0x133   :  { %748 = vtanh.f32 %v274_v52  ;;  %v695_v56 = vpack.c.bf16 %v737_v50, %v739_v54  ;;  %v547_v49 = vshrl.u32 %v546_v48, 7  ;;  %v466_v50 = vpop.permute.xlu0 %465  ;;  %v542_v54 = vld [vmem:[#allocation5] sm:$0x1] }
 0x134   :  { %750 = vtanh.f32 %v269_v55 }
 0x135   :  { %v741_v57 = vpop.eup %740  ;;  %696 = vmatprep.subr.bf16.mxu1 %v695_v56 }
 0x136   :  { %v743_v58 = vpop.eup %742  ;;  %698 = vmatpush3.bf16.msra.mxu1 %v695_v56  ;;  %v548_v56 = vsub.s32 0, %v547_v49 }
 0x137   :  { %v699_v59 = vpack.c.bf16 %v741_v57, %v743_v58 }
 0x139   :  { %v745_v60 = vpop.eup %744  ;;  %700 = vmatprep.subr.bf16.mxu1 %v699_v59 }
 0x13a   :  { %v747_v61 = vpop.eup %746  ;;  %702 = vmatpush3.bf16.msra.mxu1 %v699_v59 }
 0x13b   :  { %v703_v62 = vpack.c.bf16 %v745_v60, %v747_v61 }
 0x13d   :  { %v749_v63 = vpop.eup %748  ;;  %704 = vmatprep.subr.bf16.mxu1 %v703_v62 }
 0x13e   :  { %v751_v0 = vpop.eup %750  ;;  %706 = vmatpush3.bf16.msra.mxu1 %v703_v62 }
 0x13f   :  { %v707_v1 = vpack.c.bf16 %v749_v63, %v751_v0 }
 0x141   :  { %708 = vmatprep.subr.bf16.mxu1 %v707_v1 }
 0x142   :  { %710 = vmatpush3.bf16.msra.mxu1 %v707_v1 }
 0x145   :  { %661 = vmatmul.mubr.msk.f32.vlgmr.msra.gmra.mrb[0].mxu1 %vm325_vm1, %v82_v2 }
 0x146   :  { %663 = vmatprep.mubr.msk.f32.mxu1 %vm325_vm1, %v83_v3 }
 0x149   :  { %664 = vmatmul.mubr.msk.f32.gmra.mrb[2].mxu1 %vm325_vm1, %v84_v4 }
 0x14a   :  { %666 = vmatprep.mubr.msk.f32.mxu1 %vm325_vm1, %v85_v5 }
 0x14d   :  { %667 = vmatmul.mubr.msk.f32.gmra.mrb[4].mxu1 %vm325_vm1, %v86_v6 }
 0x14e   :  { %669 = vmatprep.mubr.msk.f32.mxu1 %vm325_vm1, %v87_v7 }
 0x151   :  { %670 = vmatmul.mubr.msk.f32.gmra.mrb[6].mxu1 %vm325_vm1, %v88_v8 }
 0x218   :  { %v662_v14 = vpop.f32.mrb[0].mxu1 }
 0x219   :  { %v422_v16 = vadd.f32 %v662_v14, %v293_v11  ;;  %v416_v17 = vpop.f32.mrb[1].mxu1 }
 0x21a   :  { %v417_v18 = vadd.f32 %v416_v17, %v288_v12 }
 0x21b   :  { %752 = vtanh.f32 %v422_v16 }
 0x21c   :  { %754 = vtanh.f32 %v417_v18  ;;  %v665_v19 = vpop.f32.mrb[2].mxu1 }
 0x21d   :  { %v432_v20 = vadd.f32 %v665_v19, %v303_v13  ;;  %v426_v21 = vpop.f32.mrb[3].mxu1 }
 0x21e   :  { %v427_v23 = vadd.f32 %v426_v21, %v298_v15 }
 0x21f   :  { %756 = vtanh.f32 %v432_v20 }
 0x220   :  { %758 = vtanh.f32 %v427_v23  ;;  %v668_v25 = vpop.f32.mrb[4].mxu1 }
 0x221   :  { %v442_v26 = vadd.f32 %v668_v25, %v313_v22  ;;  %v436_v27 = vpop.f32.mrb[5].mxu1 }
 0x222   :  { %v437_v28 = vadd.f32 %v436_v27, %v308_v24 }
 0x223   :  { %760 = vtanh.f32 %v442_v26 }
 0x224   :  { %762 = vtanh.f32 %v437_v28  ;;  %v671_v30 = vpop.f32.mrb[6].mxu1 }
 0x225   :  { %v753_v31 = vpop.eup %752  ;;  %v452_v33 = vadd.f32 %v671_v30, %v323_v29  ;;  %v446_v34 = vpop.f32.mrb[7].mxu1 }
 0x226   :  { %v755_v35 = vpop.eup %754  ;;  %v447_v36 = vadd.f32 %v446_v34, %v318_v32 }
 0x227   :  { %764 = vtanh.f32 %v452_v33  ;;  %v712_v37 = vpack.c.bf16 %v753_v31, %v755_v35 }
 0x228   :  { %766 = vtanh.f32 %v447_v36 }
 0x229   :  { %v757_v38 = vpop.eup %756  ;;  %713 = vmatpush3.bf16.msra.mxu0 %v712_v37 }
 0x22a   :  { %v759_v39 = vpop.eup %758  ;;  %714 = vmatprep.subr.bf16.mxu0 %v893_v9 }
 0x22b   :  { %v715_v40 = vpack.c.bf16 %v757_v38, %v759_v39 }
 0x22d   :  { %v761_v41 = vpop.eup %760  ;;  %716 = vmatpush3.bf16.msra.mxu0 %v715_v40 }
 0x22e   :  { %v763_v42 = vpop.eup %762  ;;  %717 = vmatprep.subr.bf16.mxu0 %v893_v9 }
 0x22f   :  { %v718_v43 = vpack.c.bf16 %v761_v41, %v763_v42 }
 0x231   :  { %v765_v44 = vpop.eup %764  ;;  %719 = vmatpush3.bf16.msra.mxu0 %v718_v43 }
 0x232   :  { %v767_v45 = vpop.eup %766  ;;  %720 = vmatprep.subr.bf16.mxu0 %v893_v9 }
 0x233   :  { %v721_v46 = vpack.c.bf16 %v765_v44, %v767_v45 }
 0x235   :  { %722 = vmatpush3.bf16.msra.mxu0 %v721_v46 }
 0x238   :  { %689 = vmatmul.mubr.msk.f32.vlgmr.msra.gmra.mrb[8].mxu0 %vm325_vm1, %v89_v47 }
 0x30b   :  { %v537_v51 = vpop.f32.mrb[8].mxu0 }
 0x30c   :  { %v538_v52 = vadd.f32 %v537_v51, %v466_v50  ;;  %v690_v53 = vpop.f32.mrb[9].mxu0 }
 0x30e   :  { %v541_v55 = vmul.f32 %v538_v52, %v538_v52 }
 0x310   :  { %v543_v57 = vsub.f32 %v542_v54, %v541_v55  ;;  %v544_v58 = vmul.f32 0.5, %v541_v55 }
 0x312   :  { %v549_v59 = vrot.slane %v543_v57, %v548_v56 }
 0x314   :  { %v551_v60 = vmul.f32 %v549_v59, %v544_v58 }
 0x316   :  { %v552_v61 = vmul.f32 %v551_v60, %v549_v59 }
 0x318   :  { %v554_v62 = vrot.slane %v552_v61, 7 }
 0x31a   :  { %v557_v63 = vsel %vm556_vm3, %v541_v55, %v554_v62 }
 0x31b   :  { %558 = vst [vmem:[#allocation10] sm:$0x7] %v557_v63 }
 0x31c   :  { %867 = shalt.err (!%p864_p8)
}
 0x31d   :  { %s868_s14 = scalar_lea.hbm %s1026_s4, 64 }
 0x31e   :  { %p869_p9 = scmp.ne.s32.totalorder %s1026_s4, %s868_s14  ;;  %p872_p10 = scmp.lt.u32.totalorder %s868_s14, %s1026_s4 }
 0x320   :  { %p874_p11 = pnand %p872_p10, %p869_p9 }
 0x322   :  { %877 = shalt.err (!%p874_p11)
}
 0x323   :  { %568 = dma.vmem_to_hbm [thread:$0]  %s566_s11, 64, %s1026_s4, [#allocation4]  }
 0x324   :  { %884 = dma.done.wait [#allocation4], 64  }
 0x325   :  { %885 = vsyncadd [#allocation4], 4294967232 }
 0x326   :  { %572 = vsyncpa [#allocation3], 1 }
 0x327   :  { %573 = vsyncpa [#allocation6], 1 }
 0x328   :  { %574 = vsyncpa [#allocation9], 1 }
 0x329   :  { %575 = vsyncpa [#allocation4], 1 }

</bundles_post_ra>
